<compile_context>
chip_gen: v6e
topology: v6e:2x2x1
jax: 0.10.0
libtpu: 0.0.40
codegen_flags: <defaults>
</compile_context>

<pallas_src>
import jax
import jax.numpy as jnp
import numpy as np
from jax.experimental import pallas as pl
from jax.experimental.pallas import tpu as pltpu

# ----------------------- model config (mirrors Model.__init__) -----------------------
IN_F, H1, H2, OUT_F = 4, 8, 9, 3
PAD = 128                  # lane width of the weight slabs / output slab
IN_PAD = 8                 # input feature lanes (IN_F=4 real + zeros + ones lane)
ONE_IN = 7                 # "ones" lane index in the augmented input
ONE_H1 = H1                # "ones" lane index in the h1 activation space (lane 8)
ONE_H2 = H2                # "ones" lane index in the h2 activation space (lane 9)
W1_R0, W1_ROWS = 0, 8      # (8,128)  rows = augmented input lanes
W2_R0, W2_ROWS = 8, 16     # (16,128) rows = first 16 lanes of h1 (features 0..7, ones at 8)
W3_R0, W3_ROWS = 24, 16    # (16,128) rows = first 16 lanes of h2 (features 0..8, ones at 9)
P_ROWS = W1_ROWS + W2_ROWS + W3_ROWS   # 40 rows total, sublane aligned
K2 = 16                    # lanes of h1 consumed by fc2
K3 = 16                    # lanes of h2 consumed by out
TB_MAX = 256               # max batch rows per grid step


# ----------------------- Pallas kernel -----------------------
def mlp_kernel(x_ref, p_ref, o_ref):
    # Static, 8-aligned row slices of the packed parameter slab (free ref views).
    w1 = p_ref[W1_R0:W1_R0 + W1_ROWS, :]   # (8, 128)
    w2 = p_ref[W2_R0:W2_R0 + W2_ROWS, :]   # (16, 128)
    w3 = p_ref[W3_R0:W3_R0 + W3_ROWS, :]   # (16, 128)

    # Inject the bias "ones" lane into the compact activation block (one VPU select).
    x = x_ref[...]                                               # (TB, 8)
    lane = jax.lax.broadcasted_iota(jnp.int32, x.shape, dimension=1)
    x = jnp.where(lane == ONE_IN, jnp.float32(1.0), x)

    # fc1 (+b1 folded) -> ReLU.  h1 features at lanes 0..7, ones lane at 8.
    h = jnp.dot(x, w1, preferred_element_type=jnp.float32)       # (TB, 128)
    h = jnp.maximum(h, 0.0)

    # fc2 (+b2 folded) -> ReLU.  h2 features at lanes 0..8, ones lane at 9.
    h = jnp.dot(h[:, 0:K2], w2, preferred_element_type=jnp.float32)
    h = jnp.maximum(h, 0.0)

    # out head (+b3 folded); lane-dense (TB, 128) store, real outputs at lanes 0..2.
    o_ref[...] = jnp.dot(h[:, 0:K3], w3, preferred_element_type=jnp.float32)


# ----------------------- parameter packing -----------------------
def pack_params(P):
    """Pack w1,b1,w2,b2,w3,b3 into one compact (40, 128) f32 slab with biases folded
    onto the 'ones' rows and ones-lane propagation entries."""
    buf = np.zeros((P_ROWS, PAD), dtype=np.float32)
    # layer 1 slab: rows = augmented input lanes (x at 0..3, ones at 7)
    buf[W1_R0:W1_R0 + IN_F, 0:H1] = np.asarray(P["w1"])
    buf[W1_R0 + ONE_IN, 0:H1] = np.asarray(P["b1"])
    buf[W1_R0 + ONE_IN, ONE_H1] = 1.0                 # propagate ones lane into h1
    # layer 2 slab: rows = h1 lanes (features 0..7, ones at 8)
    buf[W2_R0:W2_R0 + H1, 0:H2] = np.asarray(P["w2"])
    buf[W2_R0 + ONE_H1, 0:H2] = np.asarray(P["b2"])
    buf[W2_R0 + ONE_H1, ONE_H2] = 1.0                 # propagate ones lane into h2
    # layer 3 slab: rows = h2 lanes (features 0..8, ones at 9)
    buf[W3_R0:W3_R0 + H2, 0:OUT_F] = np.asarray(P["w3"])
    buf[W3_R0 + ONE_H2, 0:OUT_F] = np.asarray(P["b3"])
    return jnp.asarray(buf)


# ----------------------- tiling helpers -----------------------
def _round_up(n, m):
    return ((n + m - 1) // m) * m


def _choose_tile(batch):
    """Largest batch tile (multiple of 8, <= TB_MAX) that still gives >=2 balanced grid
    steps when the batch is big enough -- so v7x's two TensorCores both get work."""
    bp8 = _round_up(batch, 8)
    if bp8 <= 16:
        return bp8                       # tiny / latency case: single grid step
    tb = min(TB_MAX, bp8)
    if bp8 <= tb:                        # whole batch fits one step -> split in two
        tb = _round_up(bp8 // 2, 8)
    return tb


# ----------------------- wrapper -----------------------
def model_forward(x, packed_params):
    B = x.shape[0]
    tb = _choose_tile(B)
    b_pad = _round_up(B, tb)

    # Single pad op: batch to a tile multiple, features 4 -> 8 lanes (zeros; the ones
    # lane is injected inside the kernel).
    x_p = jnp.pad(x.astype(jnp.float32), ((0, b_pad - B), (0, IN_PAD - IN_F)))

    out = pl.pallas_call(
        mlp_kernel,
        out_shape=jax.ShapeDtypeStruct((b_pad, PAD), jnp.float32),
        grid=(b_pad // tb,),
        in_specs=[
            pl.BlockSpec((tb, IN_PAD), lambda i: (i, 0)),       # compact activations
            pl.BlockSpec((P_ROWS, PAD), lambda i: (0, 0)),      # packed params, VMEM-resident
        ],
        out_specs=pl.BlockSpec((tb, PAD), lambda i: (i, 0)),    # lane-dense output slab
        compiler_params=pltpu.CompilerParams(
            dimension_semantics=("parallel",)),                 # shard batch across TCs
    )(x_p, packed_params)
    return out[:B, :OUT_F]


# ----------------------- deterministic parameter init -----------------------
def init_params(key):
    def nrm(k, shape, scale=0.1):
        return scale * jax.random.normal(k, shape, dtype=jnp.float32)

    ks = jax.random.split(key, 6)
    # Weights stored as (in_features, out_features) so the kernel does x @ W + b.
    return {
        "w1": nrm(ks[0], (IN_F, H1)),
        "b1": nrm(ks[1], (H1,)),
        "w2": nrm(ks[2], (H1, H2)),
        "b2": nrm(ks[3], (H2,)),
        "w3": nrm(ks[4], (H2, OUT_F)),
        "b3": nrm(ks[5], (OUT_F,)),
    }


# ----------------------- pure-JAX reference -----------------------
def reference(x, P):
    h = jnp.maximum(x @ P["w1"] + P["b1"], 0.0)
    h = jnp.maximum(h @ P["w2"] + P["b2"], 0.0)
    return h @ P["w3"] + P["b3"]


if __name__ == "__main__":
    key = jax.random.PRNGKey(0)
    kp, kx1, kx2 = jax.random.split(key, 3)
    P = init_params(kp)
    packed = pack_params(P)

    # Tiny latency case (single grid step).
    x1 = jax.random.normal(kx1, (8, IN_F), dtype=jnp.float32)
    out1 = jax.block_until_ready(model_forward(x1, packed))
    assert out1.shape == (8, OUT_F)
    np.testing.assert_allclose(np.asarray(out1), np.asarray(reference(x1, P)),
                               rtol=1e-4, atol=1e-4)

    # Multi-step case (exercises batch padding + >=2 grid steps / megacore path).
    x2 = jax.random.normal(kx2, (40, IN_F), dtype=jnp.float32)
    out2 = jax.block_until_ready(model_forward(x2, packed))
    assert out2.shape == (40, OUT_F)
    np.testing.assert_allclose(np.asarray(out2), np.asarray(reference(x2, P)),
                               rtol=1e-4, atol=1e-4)

    print("KERNEL_OK")
</pallas_src>

<mosaic_0001>
module attributes {stable_mosaic.version = 11 : i64} {
  func.func @mlp_kernel(%arg0: i32, %arg1: memref<8x8xf32, #tpu.memory_space<vmem>>, %arg2: memref<40x128xf32, #tpu.memory_space<vmem>>, %arg3: memref<8x128xf32, #tpu.memory_space<vmem>>) attributes {dimension_semantics = [#tpu.dimension_semantics<parallel>], iteration_bounds = array<i64: 1>, scalar_prefetch = 0 : i64, scratch_operands = 0 : i64, tpu.core_type = #tpu.core_type<tc>, window_params = [{transform_indices = @transform_0, window_bounds = array<i64: 8, 8>}, {pipeline_mode = #tpu.pipeline_mode<synchronous>, transform_indices = @transform_1, window_bounds = array<i64: 40, 128>}, {transform_indices = @transform_2, window_bounds = array<i64: 8, 128>}]} {
    %c0 = arith.constant 0 : index
    %c0_0 = arith.constant 0 : index
    %0 = vector.load %arg2[%c0, %c0_0] : memref<40x128xf32, #tpu.memory_space<vmem>>, vector<8x128xf32>
    %c8 = arith.constant 8 : index
    %c0_1 = arith.constant 0 : index
    %1 = vector.load %arg2[%c8, %c0_1] : memref<40x128xf32, #tpu.memory_space<vmem>>, vector<16x128xf32>
    %c24 = arith.constant 24 : index
    %c0_2 = arith.constant 0 : index
    %2 = vector.load %arg2[%c24, %c0_2] : memref<40x128xf32, #tpu.memory_space<vmem>>, vector<16x128xf32>
    %c0_3 = arith.constant 0 : index
    %c0_4 = arith.constant 0 : index
    %3 = vector.load %arg1[%c0_3, %c0_4] : memref<8x8xf32, #tpu.memory_space<vmem>>, vector<8x8xf32>
    %4 = tpu.iota {dimensions = array<i32: 1>} : vector<8x8xi32>
    %c7_i32 = arith.constant 7 : i32
    %5 = vector.broadcast %c7_i32 : i32 to vector<8x8xi32>
    %6 = arith.cmpi eq, %4, %5 : vector<8x8xi32>
    %cst = arith.constant 1.000000e+00 : f32
    %7 = vector.broadcast %cst : f32 to vector<8x8xf32>
    %8 = arith.select %6, %7, %3 : vector<8x8xi1>, vector<8x8xf32>
    %cst_5 = arith.constant dense<0.000000e+00> : vector<8x128xf32>
    %9 = tpu.matmul %8, %0, %cst_5 {dimension_numbers = #tpu.dot_dimension_numbers<[1], [0], [0], [1], [0, 0, 1, 1], [], []>} : vector<8x8xf32>, vector<8x128xf32>, vector<8x128xf32> -> vector<8x128xf32>
    %cst_6 = arith.constant 0.000000e+00 : f32
    %10 = vector.broadcast %cst_6 : f32 to vector<8x128xf32>
    %11 = arith.maximumf %9, %10 : vector<8x128xf32>
    %12 = vector.extract_strided_slice %11 {offsets = [0, 0], sizes = [8, 16], strides = [1, 1]} : vector<8x128xf32> to vector<8x16xf32>
    %cst_7 = arith.constant dense<0.000000e+00> : vector<8x128xf32>
    %13 = tpu.matmul %12, %1, %cst_7 {dimension_numbers = #tpu.dot_dimension_numbers<[1], [0], [0], [1], [0, 0, 1, 1], [], []>} : vector<8x16xf32>, vector<16x128xf32>, vector<8x128xf32> -> vector<8x128xf32>
    %cst_8 = arith.constant 0.000000e+00 : f32
    %14 = vector.broadcast %cst_8 : f32 to vector<8x128xf32>
    %15 = arith.maximumf %13, %14 : vector<8x128xf32>
    %16 = vector.extract_strided_slice %15 {offsets = [0, 0], sizes = [8, 16], strides = [1, 1]} : vector<8x128xf32> to vector<8x16xf32>
    %cst_9 = arith.constant dense<0.000000e+00> : vector<8x128xf32>
    %17 = tpu.matmul %16, %2, %cst_9 {dimension_numbers = #tpu.dot_dimension_numbers<[1], [0], [0], [1], [0, 0, 1, 1], [], []>} : vector<8x16xf32>, vector<16x128xf32>, vector<8x128xf32> -> vector<8x128xf32>
    %c0_10 = arith.constant 0 : index
    %c0_11 = arith.constant 0 : index
    %18 = vector.load %arg3[%c0_10, %c0_11] : memref<8x128xf32, #tpu.memory_space<vmem>>, vector<8x128xf32>
    tpu.vector_store %arg3[%c0_10, %c0_11], %17 {strides = array<i32>} : memref<8x128xf32, #tpu.memory_space<vmem>>, vector<8x128xf32>,
    return
  }
  func.func @transform_0(%arg0: i32) -> (i32, i32) {
    %c0_i32 = arith.constant 0 : i32
    %c0_i32_0 = arith.constant 0 : i32
    return %arg0, %c0_i32 : i32, i32
  }
  func.func @transform_1(%arg0: i32) -> (i32, i32) {
    %c0_i32 = arith.constant 0 : i32
    %c0_i32_0 = arith.constant 0 : i32
    %c0_i32_1 = arith.constant 0 : i32
    return %c0_i32, %c0_i32_0 : i32, i32
  }
  func.func @transform_2(%arg0: i32) -> (i32, i32) {
    %c0_i32 = arith.constant 0 : i32
    %c0_i32_0 = arith.constant 0 : i32
    return %arg0, %c0_i32 : i32, i32
  }
}

</mosaic_0001>

<bundles_post_ra>
// kernel: tpu_custom_call.1
= control target key start
LH: loop header
LB: loop body
LE: loop exit
PB: predicated region body
PF: predicated region fallthrough
CT: control target
= control target key end

     0   :  { %7 = vsyncpa [#allocation3], 0  ;;  %s422_s0 = inlined_call_operand.hbm [shape: f32[8,8], index: 0, kind: input, shape index: {}]   ;;  %s423_s1 = inlined_call_operand.hbm [shape: f32[40,128], index: 1, kind: input, shape index: {}]   ;;  %s424_s2 = inlined_call_operand.hbm [shape: f32[8,128], index: 2, kind: output, shape index: {}]  }
   0x1   :  { %8 = vsyncpa [#allocation6], 0 }
   0x2   :  { %9 = vsyncpa [#allocation4], 0  ;;  %s391_s9 = smov [#allocation2]   ;;  %s392_s11 = smov [#allocation5]  }
   0x3   :  { %s16_s10 = sshll.u32 %s391_s9, 4  ;;  %s25_s12 = sshll.u32 %s392_s11, 4  ;;  %s17_s10 = int_to_ptr.vmem [resolvable:$true] %s16_s10  ;;  %s26_s12 = int_to_ptr.vmem [resolvable:$true] %s25_s12 }
   0x4   :  { %s333_s13 = scalar_lea.vmem %s17_s10, 128  ;;  %p338_p1 = scmp.lt.s32.totalorder %s17_s10, %s17_s10 }
   0x5   :  { %p334_p0 = scmp.ne.s32.totalorder %s17_s10, %s333_s13  ;;  %p339_p2 = scmp.lt.s32.totalorder %s333_s13, %s333_s13 }
   0x7   :  { %p340_p3 = por %p339_p2, %p338_p1 }
   0x9   :  { %p341_p4 = pnand %p340_p3, %p334_p0 }
   0xb   :  { %344 = shalt.err (!%p341_p4)
}
   0xc   :  { %19 = dma.hbm_to_vmem [thread:$0]  %s422_s0, 128, %s17_s10, [#allocation3]  }
   0xd   :  { %s353_s16 = scalar_lea.vmem %s26_s12, 640  ;;  %p358_p6 = scmp.lt.s32.totalorder %s26_s12, %s26_s12 }
   0xe   :  { %p354_p5 = scmp.ne.s32.totalorder %s26_s12, %s353_s16  ;;  %p359_p7 = scmp.lt.s32.totalorder %s353_s16, %s353_s16 }
  0x10   :  { %p360_p8 = por %p359_p7, %p358_p6 }
  0x12   :  { %p361_p9 = pnand %p360_p8, %p354_p5 }
  0x14   :  { %364 = shalt.err (!%p361_p9)
}
  0x15   :  { %s393_s17 = smov 128   ;;  %s394_s18 = smov 8  }
  0x16   :  { %31 = dma.hbm_to_vmem [thread:$0]  %s423_s1, 640, %s26_s12, [#allocation6], %s393_s17, %s393_s17, %s394_s18  }
  0x17   :  { %385 = dma.done.wait [#allocation3], 128  }
  0x18   :  { %386 = vsyncadd [#allocation3], 4294967168 }
  0x19   :  { %387 = dma.done.wait [#allocation6], 640  }
  0x1a   :  { %388 = vsyncadd [#allocation6], 4294966656  ;;  %v44_v0 = vlaneseq  ;;  %v395_v1 = vmov 0.0   ;;  %vm396_vm0 = vmmov 0   ;;  %vm48_vm2 = vcmask 64512   ;;  %v38_v3 = vld [vmem:[#allocation5] sm:$0xff] }
  0x1b   :  { %299 = vmatprep.subr.mxu0 %v395_v1  ;;  %301 = vmatprep.mubr.msk.f32.mxu0 %vm396_vm0, %v395_v1  ;;  %v43_v4 = vld [vmem:[#allocation2] sm:$0xff]  ;;  %v40_v6 = vld [vmem:[#allocation5 + $0x10] sm:$0xff]  ;;  %v39_v7 = vld [vmem:[#allocation5 + $0x8] sm:$0xff]  ;;  %vm123_vm3 = vcmask 130048   ;;  %s397_s0 = smov [#allocation7]  }
  0x1c   :  { %v45_v2 = vand.u32 127, %v44_v0  ;;  %304 = vmatprep.subr.mxu1 %v395_v1  ;;  %308 = vmatprep.mubr.msk.f32.mxu1 %vm396_vm0, %v395_v1  ;;  %v42_v8 = vld [vmem:[#allocation5 + $0x20] sm:$0xff]  ;;  %v41_v12 = vld [vmem:[#allocation5 + $0x18] sm:$0xff]  ;;  %s278_s1 = sshll.u32 %s397_s0, 4  ;;  %s279_s1 = int_to_ptr.vmem [resolvable:$true] %s278_s1 }
  0x1d   :  { %300 = vmatpush3.msra.mxu0 %v38_v3  ;;  %305 = vmatpush3.msra.mxu1 %v40_v6  ;;  %s365_s21 = scalar_lea.vmem %s279_s1, 128  ;;  %p370_p11 = scmp.lt.s32.totalorder %s279_s1, %s279_s1 }
  0x1e   :  { %vm46_vm1 = vcmp.eq.s32.totalorder %v45_v2, 7  ;;  %311 = vmatprep.subr.mxu0 %v395_v1  ;;  %306 = vmatprep.subr.mxu1 %v395_v1  ;;  %p366_p10 = scmp.ne.s32.totalorder %s279_s1, %s365_s21  ;;  %p371_p12 = scmp.lt.s32.totalorder %s365_s21, %s365_s21 }
  0x1f   :  { %v47_v5 = vsel %vm46_vm1, 1.0, %v43_v4  ;;  %307 = vmatpush3.msra.mxu1 %v39_v7 }
  0x20   :  { %302 = vmatmul.mubr.msk.f32.vlgmr.msra.gmra.mxu0 %vm48_vm2, %v47_v5  ;;  %p372_p13 = por %p371_p12, %p370_p11 }
  0x21   :  { %315 = vmatprep.mubr.msk.f32.mxu0 %vm396_vm0, %v395_v1  ;;  %312 = vmatpush3.msra.mxu0 %v42_v8 }
  0x22   :  { %313 = vmatprep.subr.mxu0 %v395_v1  ;;  %p373_p0 = pnand %p372_p13, %p366_p10 }
  0x23   :  { %314 = vmatpush3.msra.mxu0 %v41_v12 }
  0xe0   :  { %v118_v9 = vpop.f32.mrf.mxu0 }
  0xe1   :  { %v122_v10 = vmax.f32 %v118_v9, 0.0 }
  0xe2   :  { %v303_v11 = vpop.f32.mrf.mxu0 }
  0xe3   :  { %309 = vmatmul.mubr.msk.f32.vlgmr.msra.gmra.mxu1 %vm123_vm3, %v122_v10 }
 0x1a3   :  { %v193_v13 = vpop.f32.mrf.mxu1 }
 0x1a4   :  { %v197_v14 = vmax.f32 %v193_v13, 0.0 }
 0x1a5   :  { %v310_v15 = vpop.f32.mrf.mxu1 }
 0x1a6   :  { %316 = vmatmul.mubr.msk.f32.vlgmr.msra.gmra.mxu0 %vm123_vm3, %v197_v14 }
 0x266   :  { %v267_v16 = vpop.f32.mrf.mxu0 }
 0x267   :  { %271 = vst [vmem:[#allocation7] sm:$0xff] %v267_v16 }
 0x268   :  { %v317_v17 = vpop.f32.mrf.mxu0 }
 0x269   :  { %376 = shalt.err (!%p373_p0)
}
 0x26a   :  { %281 = dma.vmem_to_hbm [thread:$0]  %s279_s1, 128, %s424_s2, [#allocation4]  }
 0x26b   :  { %389 = dma.done.wait [#allocation4], 128  }
 0x26c   :  { %390 = vsyncadd [#allocation4], 4294967168 }
 0x26d   :  { %285 = vsyncpa [#allocation3], 1 }
 0x26e   :  { %286 = vsyncpa [#allocation6], 1 }
 0x26f   :  { %287 = vsyncpa [#allocation4], 1 }

</bundles_post_ra>
